<compile_context>
chip_gen: v5e
topology: v5e:2x2
jax: 0.10.0
libtpu: 0.0.40
codegen_flags: <defaults>
</compile_context>

<pallas_src>
import jax
import jax.numpy as jnp
from jax.experimental import pallas as pl
from jax.experimental.pallas import tpu as pltpu

# ----------------------------------------------------------------------------
# Model hyperparameters
# ----------------------------------------------------------------------------
INPUT_SIZE = 8
OUTPUT_SIZE = 4
HLWAF = 2
N1 = 32
HLWOAF = 1
N2 = 2
LN = True
LN_EPS = 1e-5            # torch.nn.LayerNorm default
LANES = 128
DOT_DTYPE = jnp.bfloat16  # MXU operand dtype (accumulation stays f32)


def _round_up(v, m):
    return ((v + m - 1) // m) * m


def build_layer_dims():
    """Replicates Model.__init__. Each entry: (din, dout, ln, act)."""
    layers = []

    def add(din, dout, ln=False, act=False):
        layers.append((din, dout, ln, act))

    if HLWOAF > 0:
        add(INPUT_SIZE, OUTPUT_SIZE * N2 ** 1)
        for i in range(HLWOAF - 1):
            add(OUTPUT_SIZE * N2 ** (i + 1), OUTPUT_SIZE * N2 ** (i + 2))
        add(OUTPUT_SIZE * N2 ** HLWOAF, N1, LN, True)
    else:
        add(INPUT_SIZE, N1, LN, True)
    for _ in range(HLWAF - 1):
        add(N1, N1, LN, True)
    if HLWOAF > 0:
        add(N1, OUTPUT_SIZE * N2 ** HLWOAF)
        for i in range(HLWOAF):
            add(OUTPUT_SIZE * N2 ** (HLWOAF - i), OUTPUT_SIZE * N2 ** (HLWOAF - i - 1))
    else:
        add(N1, OUTPUT_SIZE)
    return layers


LAYERS = build_layer_dims()
OUT_DIM = LAYERS[-1][1]


# ----------------------------------------------------------------------------
# Fold consecutive affine-only layers; lay out a bf16 weight slab and a small
# f32 bias/LayerNorm slab with static row offsets.
# ----------------------------------------------------------------------------
def build_folded_layout(layers):
    # group maximal runs of affine-only layers with the LN/act layer that ends them
    groups, cur = [], []
    for li, (_din, _dout, ln, act) in enumerate(layers):
        cur.append(li)
        if ln or act:
            groups.append(cur)
            cur = []
    if cur:
        groups.append(cur)

    folded, w_row, s_row = [], 0, 0
    for grp in groups:
        din = layers[grp[0]][0]
        dout = layers[grp[-1]][1]
        ln = layers[grp[-1]][2]
        act = layers[grp[-1]][3]
        entry = dict(members=tuple(grp), din=din, dout=dout, ln=ln, act=act,
                     w_row=w_row, b_row=s_row, g_row=None, be_row=None)
        w_row += _round_up(din, 16)        # bf16 sublane alignment (16, 128)
        s_row += 1
        if ln:
            entry["g_row"] = s_row
            s_row += 1
            entry["be_row"] = s_row
            s_row += 1
        folded.append(entry)
    return folded, _round_up(w_row, 16), _round_up(s_row, 8)


FOLDED, W_ROWS, S_ROWS = build_folded_layout(LAYERS)


def fold_and_pack(params_flat):
    """Fold affine chains (W <- Wa@Wb, b <- ba@Wb + bb); pack folded weights
    into one (W_ROWS, 128) bf16 slab and biases/LN params into a (S_ROWS, 128)
    f32 slab at static row offsets."""
    per_layer, idx = [], 0
    for (_din, _dout, ln, _act) in LAYERS:
        w, b = params_flat[idx], params_flat[idx + 1]
        idx += 2
        g = be = None
        if ln:
            g, be = params_flat[idx], params_flat[idx + 1]
            idx += 2
        per_layer.append((w, b, g, be))

    w_slab = jnp.zeros((W_ROWS, LANES), jnp.float32)
    s_slab = jnp.zeros((S_ROWS, LANES), jnp.float32)
    for f in FOLDED:
        mem = f["members"]
        W, B = per_layer[mem[0]][0], per_layer[mem[0]][1]
        for li in mem[1:]:
            w, b = per_layer[li][0], per_layer[li][1]
            W = W @ w
            B = B @ w + b
        w_slab = w_slab.at[f["w_row"]:f["w_row"] + f["din"], :f["dout"]].set(W)
        s_slab = s_slab.at[f["b_row"], :f["dout"]].set(B[0])
        if f["ln"]:
            g, be = per_layer[mem[-1]][2], per_layer[mem[-1]][3]
            s_slab = s_slab.at[f["g_row"], :f["dout"]].set(g[0])
            s_slab = s_slab.at[f["be_row"], :f["dout"]].set(be[0])
    return w_slab.astype(DOT_DTYPE), s_slab


# ----------------------------------------------------------------------------
# Pallas kernel: full folded MLP on one batch tile (everything in VMEM)
# ----------------------------------------------------------------------------
def mlp_kernel(x_ref, w_ref, s_ref, o_ref):
    h = x_ref[...]                                    # (TB, INPUT_SIZE) f32
    for f in FOLDED:                                  # static unroll (3 groups)
        din, cols = f["din"], f["dout"]
        w = w_ref[f["w_row"]:f["w_row"] + din, :cols]           # bf16, no cast
        b = s_ref[f["b_row"]:f["b_row"] + 1, :cols]             # f32
        h = jnp.dot(h.astype(DOT_DTYPE), w,
                    preferred_element_type=jnp.float32) + b
        if f["ln"]:
            g = s_ref[f["g_row"]:f["g_row"] + 1, :cols]
            be = s_ref[f["be_row"]:f["be_row"] + 1, :cols]
            mu = jnp.mean(h, axis=-1, keepdims=True)
            d = h - mu
            var = jnp.mean(d * d, axis=-1, keepdims=True)       # two-pass LN
            h = d * jax.lax.rsqrt(var + LN_EPS) * g + be
        if f["act"]:
            h = jnp.tanh(h)
    o_ref[...] = h                                    # (TB, OUT_DIM) f32


def mlp_forward(x, w_slab, s_slab, *, max_tb=2048):
    batch = x.shape[0]
    if x.dtype != jnp.float32:
        x = x.astype(jnp.float32)

    padded8 = _round_up(max(batch, 1), 8)
    # Large tile to amortize per-step overhead, but keep >=2 grid steps when the
    # batch allows it so the "parallel" axis can shard across both v7x cores.
    tb = min(max_tb, max(8, _round_up(pl.cdiv(padded8, 2), 8)))
    padded = _round_up(padded8, tb)
    if padded != batch:
        x = jnp.pad(x, ((0, padded - batch), (0, 0)))

    out = pl.pallas_call(
        mlp_kernel,
        out_shape=jax.ShapeDtypeStruct((padded, OUT_DIM), jnp.float32),
        grid=(padded // tb,),
        in_specs=[
            pl.BlockSpec((tb, INPUT_SIZE), lambda i: (i, 0)),   # batch-tiled x
            pl.BlockSpec((W_ROWS, LANES), lambda i: (0, 0)),    # bf16 weights
            pl.BlockSpec((S_ROWS, LANES), lambda i: (0, 0)),    # f32 bias/LN
        ],
        out_specs=pl.BlockSpec((tb, OUT_DIM), lambda i: (i, 0)),
        compiler_params=pltpu.CompilerParams(
            dimension_semantics=("parallel",)),
    )(x, w_slab, s_slab)
    return out[:batch]


# ----------------------------------------------------------------------------
# Deterministic init (PyTorch Linear-style uniform) + pure-JAX reference
# ----------------------------------------------------------------------------
def init_params(key):
    params = []
    for (din, dout, ln, _act) in LAYERS:
        key, kw, kb = jax.random.split(key, 3)
        bound = 1.0 / float(din) ** 0.5
        w = jax.random.uniform(kw, (din, dout), jnp.float32, -bound, bound)
        b = jax.random.uniform(kb, (1, dout), jnp.float32, -bound, bound)
        params += [w, b]
        if ln:
            params += [jnp.ones((1, dout), jnp.float32),
                       jnp.zeros((1, dout), jnp.float32)]
    return params, key


def reference_forward(x, params_flat):
    """Unfolded, full-f32 layer-by-layer reference (original module semantics)."""
    h = x.astype(jnp.float32)
    idx = 0
    for (_din, _dout, ln, act) in LAYERS:
        w, b = params_flat[idx], params_flat[idx + 1]
        idx += 2
        h = h @ w + b
        if ln:
            g, be = params_flat[idx], params_flat[idx + 1]
            idx += 2
            mu = jnp.mean(h, axis=-1, keepdims=True)
            var = jnp.mean((h - mu) ** 2, axis=-1, keepdims=True)
            h = (h - mu) * jax.lax.rsqrt(var + LN_EPS) * g + be
        if act:
            h = jnp.tanh(h)
    return h


if __name__ == "__main__":
    key = jax.random.PRNGKey(0)
    params, key = init_params(key)
    w_slab, s_slab = fold_and_pack(params)

    key, kx = jax.random.split(key)
    batch = 4
    x = jax.random.normal(kx, (batch, INPUT_SIZE), jnp.float32)

    out = jax.block_until_ready(mlp_forward(x, w_slab, s_slab))
    ref = reference_forward(x, params)
    assert out.shape == (batch, OUTPUT_SIZE), out.shape
    # bf16 MXU operands + folded affines -> bf16-appropriate tolerance
    assert jnp.allclose(out, ref, atol=5e-2, rtol=5e-2), \
        float(jnp.max(jnp.abs(out - ref)))

    # Also exercise a non-tile-aligned batch (padding + multi-step grid path).
    key, kx2 = jax.random.split(key)
    x2 = jax.random.normal(kx2, (20, INPUT_SIZE), jnp.float32)
    out2 = jax.block_until_ready(mlp_forward(x2, w_slab, s_slab))
    ref2 = reference_forward(x2, params)
    assert out2.shape == (20, OUTPUT_SIZE), out2.shape
    assert jnp.allclose(out2, ref2, atol=5e-2, rtol=5e-2), \
        float(jnp.max(jnp.abs(out2 - ref2)))

    print("KERNEL_OK")
</pallas_src>

<mosaic_0001>
module attributes {stable_mosaic.version = 11 : i64} {
  func.func @mlp_kernel(%arg0: i32, %arg1: memref<8x8xf32, #tpu.memory_space<vmem>>, %arg2: memref<80x128xbf16, #tpu.memory_space<vmem>>, %arg3: memref<8x128xf32, #tpu.memory_space<vmem>>, %arg4: memref<8x4xf32, #tpu.memory_space<vmem>>) attributes {dimension_semantics = [#tpu.dimension_semantics<parallel>], iteration_bounds = array<i64: 1>, scalar_prefetch = 0 : i64, scratch_operands = 0 : i64, tpu.core_type = #tpu.core_type<tc>, window_params = [{transform_indices = @transform_0, window_bounds = array<i64: 8, 8>}, {pipeline_mode = #tpu.pipeline_mode<synchronous>, transform_indices = @transform_1, window_bounds = array<i64: 80, 128>}, {pipeline_mode = #tpu.pipeline_mode<synchronous>, transform_indices = @transform_2, window_bounds = array<i64: 8, 128>}, {transform_indices = @transform_3, window_bounds = array<i64: 8, 4>}]} {
    %c0 = arith.constant 0 : index
    %c0_0 = arith.constant 0 : index
    %0 = vector.load %arg1[%c0, %c0_0] : memref<8x8xf32, #tpu.memory_space<vmem>>, vector<8x8xf32>
    %c0_1 = arith.constant 0 : index
    %c0_2 = arith.constant 0 : index
    %1 = vector.load %arg2[%c0_1, %c0_2] : memref<80x128xbf16, #tpu.memory_space<vmem>>, vector<8x32xbf16>
    %c0_3 = arith.constant 0 : index
    %c0_4 = arith.constant 0 : index
    %2 = vector.load %arg3[%c0_3, %c0_4] : memref<8x128xf32, #tpu.memory_space<vmem>>, vector<1x32xf32>
    %3 = arith.truncf %0 : vector<8x8xf32> to vector<8x8xbf16>
    %cst = arith.constant dense<0.000000e+00> : vector<8x32xf32>
    %4 = tpu.matmul %3, %1, %cst {dimension_numbers = #tpu.dot_dimension_numbers<[1], [0], [0], [1], [0, 0, 1, 1], [], []>} : vector<8x8xbf16>, vector<8x32xbf16>, vector<8x32xf32> -> vector<8x32xf32>
    %5 = vector.broadcast %2 : vector<1x32xf32> to vector<8x32xf32>
    %6 = arith.addf %4, %5 : vector<8x32xf32>
    %c1 = arith.constant 1 : index
    %c0_5 = arith.constant 0 : index
    %7 = vector.load %arg3[%c1, %c0_5] : memref<8x128xf32, #tpu.memory_space<vmem>>, vector<1x32xf32>
    %c2 = arith.constant 2 : index
    %c0_6 = arith.constant 0 : index
    %8 = vector.load %arg3[%c2, %c0_6] : memref<8x128xf32, #tpu.memory_space<vmem>>, vector<1x32xf32>
    %cst_7 = arith.constant dense<0.000000e+00> : vector<8xf32>
    %9 = vector.multi_reduction <add>, %6, %cst_7 [1] : vector<8x32xf32> to vector<8xf32>
    %10 = vector.shape_cast %9 : vector<8xf32> to vector<8x1xf32>
    %cst_8 = arith.constant 3.200000e+01 : f32
    %11 = vector.broadcast %cst_8 : f32 to vector<8x1xf32>
    %12 = arith.divf %10, %11 : vector<8x1xf32>
    %13 = vector.broadcast %12 : vector<8x1xf32> to vector<8x32xf32>
    %14 = arith.subf %6, %13 : vector<8x32xf32>
    %15 = arith.mulf %14, %14 : vector<8x32xf32>
    %cst_9 = arith.constant dense<0.000000e+00> : vector<8xf32>
    %16 = vector.multi_reduction <add>, %15, %cst_9 [1] : vector<8x32xf32> to vector<8xf32>
    %17 = vector.shape_cast %16 : vector<8xf32> to vector<8x1xf32>
    %cst_10 = arith.constant 3.200000e+01 : f32
    %18 = vector.broadcast %cst_10 : f32 to vector<8x1xf32>
    %19 = arith.divf %17, %18 : vector<8x1xf32>
    %cst_11 = arith.constant 9.99999974E-6 : f32
    %20 = vector.broadcast %cst_11 : f32 to vector<8x1xf32>
    %21 = arith.addf %19, %20 : vector<8x1xf32>
    %22 = math.rsqrt %21 : vector<8x1xf32>
    %23 = vector.broadcast %22 : vector<8x1xf32> to vector<8x32xf32>
    %24 = arith.mulf %14, %23 : vector<8x32xf32>
    %25 = vector.broadcast %7 : vector<1x32xf32> to vector<8x32xf32>
    %26 = arith.mulf %24, %25 : vector<8x32xf32>
    %27 = vector.broadcast %8 : vector<1x32xf32> to vector<8x32xf32>
    %28 = arith.addf %26, %27 : vector<8x32xf32>
    %29 = math.tanh %28 : vector<8x32xf32>
    %c16 = arith.constant 16 : index
    %c0_12 = arith.constant 0 : index
    %30 = vector.load %arg2[%c16, %c0_12] : memref<80x128xbf16, #tpu.memory_space<vmem>>, vector<32x32xbf16>
    %c3 = arith.constant 3 : index
    %c0_13 = arith.constant 0 : index
    %31 = vector.load %arg3[%c3, %c0_13] : memref<8x128xf32, #tpu.memory_space<vmem>>, vector<1x32xf32>
    %32 = arith.truncf %29 : vector<8x32xf32> to vector<8x32xbf16>
    %cst_14 = arith.constant dense<0.000000e+00> : vector<8x32xf32>
    %33 = tpu.matmul %32, %30, %cst_14 {dimension_numbers = #tpu.dot_dimension_numbers<[1], [0], [0], [1], [0, 0, 1, 1], [], []>} : vector<8x32xbf16>, vector<32x32xbf16>, vector<8x32xf32> -> vector<8x32xf32>
    %34 = vector.broadcast %31 : vector<1x32xf32> to vector<8x32xf32>
    %35 = arith.addf %33, %34 : vector<8x32xf32>
    %c4 = arith.constant 4 : index
    %c0_15 = arith.constant 0 : index
    %36 = vector.load %arg3[%c4, %c0_15] : memref<8x128xf32, #tpu.memory_space<vmem>>, vector<1x32xf32>
    %c5 = arith.constant 5 : index
    %c0_16 = arith.constant 0 : index
    %37 = vector.load %arg3[%c5, %c0_16] : memref<8x128xf32, #tpu.memory_space<vmem>>, vector<1x32xf32>
    %cst_17 = arith.constant dense<0.000000e+00> : vector<8xf32>
    %38 = vector.multi_reduction <add>, %35, %cst_17 [1] : vector<8x32xf32> to vector<8xf32>
    %39 = vector.shape_cast %38 : vector<8xf32> to vector<8x1xf32>
    %cst_18 = arith.constant 3.200000e+01 : f32
    %40 = vector.broadcast %cst_18 : f32 to vector<8x1xf32>
    %41 = arith.divf %39, %40 : vector<8x1xf32>
    %42 = vector.broadcast %41 : vector<8x1xf32> to vector<8x32xf32>
    %43 = arith.subf %35, %42 : vector<8x32xf32>
    %44 = arith.mulf %43, %43 : vector<8x32xf32>
    %cst_19 = arith.constant dense<0.000000e+00> : vector<8xf32>
    %45 = vector.multi_reduction <add>, %44, %cst_19 [1] : vector<8x32xf32> to vector<8xf32>
    %46 = vector.shape_cast %45 : vector<8xf32> to vector<8x1xf32>
    %cst_20 = arith.constant 3.200000e+01 : f32
    %47 = vector.broadcast %cst_20 : f32 to vector<8x1xf32>
    %48 = arith.divf %46, %47 : vector<8x1xf32>
    %cst_21 = arith.constant 9.99999974E-6 : f32
    %49 = vector.broadcast %cst_21 : f32 to vector<8x1xf32>
    %50 = arith.addf %48, %49 : vector<8x1xf32>
    %51 = math.rsqrt %50 : vector<8x1xf32>
    %52 = vector.broadcast %51 : vector<8x1xf32> to vector<8x32xf32>
    %53 = arith.mulf %43, %52 : vector<8x32xf32>
    %54 = vector.broadcast %36 : vector<1x32xf32> to vector<8x32xf32>
    %55 = arith.mulf %53, %54 : vector<8x32xf32>
    %56 = vector.broadcast %37 : vector<1x32xf32> to vector<8x32xf32>
    %57 = arith.addf %55, %56 : vector<8x32xf32>
    %58 = math.tanh %57 : vector<8x32xf32>
    %c48 = arith.constant 48 : index
    %c0_22 = arith.constant 0 : index
    %59 = vector.load %arg2[%c48, %c0_22] : memref<80x128xbf16, #tpu.memory_space<vmem>>, vector<32x4xbf16>
    %c6 = arith.constant 6 : index
    %c0_23 = arith.constant 0 : index
    %60 = vector.load %arg3[%c6, %c0_23] : memref<8x128xf32, #tpu.memory_space<vmem>>, vector<1x4xf32>
    %61 = arith.truncf %58 : vector<8x32xf32> to vector<8x32xbf16>
    %cst_24 = arith.constant dense<0.000000e+00> : vector<8x4xf32>
    %62 = tpu.matmul %61, %59, %cst_24 {dimension_numbers = #tpu.dot_dimension_numbers<[1], [0], [0], [1], [0, 0, 1, 1], [], []>} : vector<8x32xbf16>, vector<32x4xbf16>, vector<8x4xf32> -> vector<8x4xf32>
    %63 = vector.broadcast %60 : vector<1x4xf32> to vector<8x4xf32>
    %64 = arith.addf %62, %63 : vector<8x4xf32>
    %c0_25 = arith.constant 0 : index
    %c0_26 = arith.constant 0 : index
    %65 = vector.load %arg4[%c0_25, %c0_26] : memref<8x4xf32, #tpu.memory_space<vmem>>, vector<8x4xf32>
    tpu.vector_store %arg4[%c0_25, %c0_26], %64 {strides = array<i32>} : memref<8x4xf32, #tpu.memory_space<vmem>>, vector<8x4xf32>,
    return
  }
  func.func @transform_0(%arg0: i32) -> (i32, i32) {
    %c0_i32 = arith.constant 0 : i32
    %c0_i32_0 = arith.constant 0 : i32
    return %arg0, %c0_i32 : i32, i32
  }
  func.func @transform_1(%arg0: i32) -> (i32, i32) {
    %c0_i32 = arith.constant 0 : i32
    %c0_i32_0 = arith.constant 0 : i32
    %c0_i32_1 = arith.constant 0 : i32
    return %c0_i32, %c0_i32_0 : i32, i32
  }
  func.func @transform_2(%arg0: i32) -> (i32, i32) {
    %c0_i32 = arith.constant 0 : i32
    %c0_i32_0 = arith.constant 0 : i32
    %c0_i32_1 = arith.constant 0 : i32
    return %c0_i32, %c0_i32_0 : i32, i32
  }
  func.func @transform_3(%arg0: i32) -> (i32, i32) {
    %c0_i32 = arith.constant 0 : i32
    %c0_i32_0 = arith.constant 0 : i32
    return %arg0, %c0_i32 : i32, i32
  }
}

</mosaic_0001>

<bundles_post_ra>
// kernel: tpu_custom_call.1
= control target key start
LH: loop header
LB: loop body
LE: loop exit
PB: predicated region body
PF: predicated region fallthrough
CT: control target
= control target key end

     0   :  { %8 = vsyncpa [#allocation3], 0  ;;  %s394_s0 = inlined_call_operand.hbm [shape: f32[8,8], index: 0, kind: input, shape index: {}]   ;;  %s395_s1 = inlined_call_operand.hbm [shape: bf16[80,128], index: 1, kind: input, shape index: {}]   ;;  %s396_s2 = inlined_call_operand.hbm [shape: f32[8,128], index: 2, kind: input, shape index: {}]   ;;  %s397_s3 = inlined_call_operand.vmem [shape: f32[8,4], index: 3, kind: output, shape index: {}]  }
   0x1   :  { %9 = vsyncpa [#allocation5], 0  ;;  %s25_s14 = sshll.u32 %s395_s1, 4  ;;  %s350_s15 = smov [#allocation4]   ;;  %s26_s14 = int_to_ptr.hbm [resolvable:$true] %s25_s14 }
   0x2   :  { %s27_s16 = sshll.u32 %s350_s15, 4  ;;  %s15_s19 = sshll.u32 %s394_s0, 4  ;;  %s28_s16 = int_to_ptr.vmem [resolvable:$true] %s27_s16  ;;  %s16_s19 = int_to_ptr.hbm [resolvable:$true] %s15_s19 }
   0x3   :  { %s351_s20 = smov 64   ;;  %s352_s21 = smov 4  }
   0x4   :  { %33 = dma.hbm_to_vmem [thread:$0]  %s26_s14, 640, %s28_s16, [#allocation5], %s351_s20, %s351_s20, %s352_s21  }
   0x5   :  { %s353_s22 = smov [#allocation2]   ;;  %s39_s26 = sshll.u32 %s396_s2, 4  ;;  %s40_s26 = int_to_ptr.hbm [resolvable:$true] %s39_s26 }
   0x6   :  { %s17_s23 = sshll.u32 %s353_s22, 4  ;;  %s354_s1 = smov [#allocation6]   ;;  %s18_s23 = int_to_ptr.vmem [resolvable:$true] %s17_s23 }
   0x7   :  { %20 = dma.hbm_to_vmem [thread:$0]  %s16_s19, 128, %s18_s23, [#allocation3]  }
   0x8   :  { %s41_s27 = sshll.u32 %s354_s1, 4  ;;  %s42_s27 = int_to_ptr.vmem [resolvable:$true] %s41_s27 }
   0x9   :  { %44 = dma.hbm_to_vmem [thread:$0]  %s40_s26, 128, %s42_s27, [#allocation5]  }
   0xa   :  { %346 = dma.done.wait [#allocation3], 128  }
   0xb   :  { %347 = vsyncadd [#allocation3], 4294967168 }
   0xc   :  { %348 = dma.done.wait [#allocation5], 768  }
   0xd   :  { %349 = vsyncadd [#allocation5], 4294966528  ;;  %vm67_vm0 = vcmask 1043456   ;;  %v59_v0 = vld [vmem:[#allocation4] sm:$0xf]  ;;  %v58_v1 = vld [vmem:[#allocation2] sm:$0xff] }
   0xe   :  { %v69_v2 = vsel %vm67_vm0, %v59_v0, 0  ;;  %v61_v3 = vpack.c.bf16 %v58_v1, %v58_v1  ;;  %vm63_vm1 = vcmask 64512   ;;  %v257_v4 = vld [vmem:[#allocation6] ss:$0 sm:$0xff]  ;;  %vm86_vm2 = vcmask 261120   ;;  %v248_v21 = vld [vmem:[#allocation4 + $0x10] sm:$0xff] }
   0xf   :  { %78 = vmatpush.bf16.msra.mxu0 %v69_v2  ;;  %v355_v9 = vmov 32.0   ;;  %149 = vmatpush.bf16.msra.mxu1 %v248_v21  ;;  %v247_v22 = vld [vmem:[#allocation4 + $0x8] sm:$0xff]  ;;  %v250_v50 = vld [vmem:[#allocation4 + $0x20] sm:$0xff]  ;;  %v249_v51 = vld [vmem:[#allocation4 + $0x18] sm:$0xff]  ;;  %vm220_vm10 = vcmask 31744  }
  0x10   :  { %264 = vrcp.f32 %v355_v9  ;;  %v258_v32 = vld [vmem:[#allocation6 + $0x1] ss:$0 sm:$0xff]  ;;  %v259_v35 = vld [vmem:[#allocation6 + $0x2] ss:$0 sm:$0xff]  ;;  %v260_v40 = vld [vmem:[#allocation6 + $0x3] ss:$0 sm:$0xff]  ;;  %213 = vmatpush.bf16.msra.mxu2 %v250_v50 }
  0x11   :  { %v261_v61 = vld [vmem:[#allocation6 + $0x4] ss:$0 sm:$0xff]  ;;  %v262_v0 = vld [vmem:[#allocation6 + $0x5] ss:$0 sm:$0xff] }
  0x12   :  { %228 = vmatmul.msk.bf16.vlgmr.msra.gmra.mxu0 %vm63_vm1, %v61_v3 }
  0x13   :  { %150 = vmatpush.bf16.msra.mxu1 %v247_v22 }
  0x14   :  { %214 = vmatpush.bf16.msra.mxu2 %v249_v51 }
  0x16   :  { %v265_v10 = vpop.eup %264 }
  0x17   :  { %v91_v11 = vmul.f32 32.0, %v265_v10  ;;  %vm95_vm3 = vweird.f32 %v265_v10 }
  0x19   :  { %v92_v12 = vsub.f32 1.0, %v91_v11 }
  0x1b   :  { %v93_v13 = vmul.f32 %v265_v10, %v92_v12 }
  0x1d   :  { %v94_v14 = vadd.f32 %v265_v10, %v93_v13 }
  0x1f   :  { %v96_v15 = vsel %vm95_vm3, %v265_v10, %v94_v14 }
  0x8f   :  { %v80_v5 = vpop.f32.mrf.mxu0 }
  0x90   :  { %v81_v6 = vadd.f32 %v257_v4, %v80_v5  ;;  %v263_v5 = vld [vmem:[#allocation6 + $0x6] ss:$0 sm:$0xff] }
  0x92   :  { %v87_v7 = vsel %vm86_vm2, %v81_v6, 0.0 }
  0x93   :  { %88 = vadd.xlane.f32.xlu0 %v87_v7 }
  0x97   :  { %v82_v8 = vpop.f32.mrf.mxu0 }
 0x106   :  { %v89_v16 = vpop.xlane.xlu0 %88 }
 0x107   :  { %v97_v17 = vmul.f32 %v96_v15, %v89_v16 }
 0x109   :  { %v98_v18 = vsub.f32 %v81_v6, %v97_v17 }
 0x10b   :  { %v99_v19 = vmul.f32 %v98_v18, %v98_v18 }
 0x10d   :  { %v100_v20 = vsel %vm86_vm2, %v99_v19, 0.0 }
 0x10e   :  { %101 = vadd.xlane.f32.xlu0 %v100_v20 }
 0x181   :  { %v102_v23 = vpop.xlane.xlu0 %101 }
 0x182   :  { %v103_v24 = vmul.f32 %v102_v23, %v96_v15 }
 0x184   :  { %v104_v25 = vadd.f32 1e-05, %v103_v24 }
 0x186   :  { %266 = vrsqrt.f32 %v104_v25  ;;  %vm111_vm5 = vweird.f32 %v104_v25 }
 0x18c   :  { %v267_v26 = vpop.eup %266 }
 0x18d   :  { %v106_v27 = vmul.f32 %v267_v26, %v104_v25  ;;  %vm112_vm4 = vweird.f32 %v267_v26 }
 0x18e   :  { %vm113_vm6 = vmor %vm111_vm5, %vm112_vm4 }
 0x18f   :  { %v107_v28 = vmul.f32 %v267_v26, %v106_v27 }
 0x191   :  { %v108_v29 = vmul.f32 0.5, %v107_v28 }
 0x193   :  { %v109_v30 = vsub.f32 1.5, %v108_v29 }
 0x195   :  { %v110_v31 = vmul.f32 %v267_v26, %v109_v30 }
 0x197   :  { %v114_v33 = vsel %vm113_vm6, %v267_v26, %v110_v31 }
 0x198   :  { %v115_v34 = vmul.f32 %v114_v33, %v98_v18 }
 0x19a   :  { %v117_v36 = vmul.f32 %v258_v32, %v115_v34 }
 0x19c   :  { %v119_v37 = vadd.f32 %v259_v35, %v117_v36 }
 0x19e   :  { %268 = vtanh.f32 %v119_v37 }
 0x1a4   :  { %v269_v38 = vpop.eup %268 }
 0x1a5   :  { %v126_v39 = vpack.c.bf16 %v269_v38, %v269_v38 }
 0x1a7   :  { %237 = vmatmul.msk.bf16.vlgmr.msra.gmra.mxu1 %vm86_vm2, %v126_v39 }
 0x224   :  { %v152_v41 = vpop.f32.mrf.mxu1 }
 0x225   :  { %v153_v42 = vadd.f32 %v260_v40, %v152_v41 }
 0x227   :  { %v158_v43 = vsel %vm86_vm2, %v153_v42, 0.0 }
 0x228   :  { %159 = vadd.xlane.f32.xlu1 %v158_v43 }
 0x22c   :  { %v154_v44 = vpop.f32.mrf.mxu1 }
 0x29b   :  { %v160_v45 = vpop.xlane.xlu1 %159 }
 0x29c   :  { %v161_v46 = vmul.f32 %v160_v45, %v96_v15 }
 0x29e   :  { %v162_v47 = vsub.f32 %v153_v42, %v161_v46 }
 0x2a0   :  { %v163_v48 = vmul.f32 %v162_v47, %v162_v47 }
 0x2a2   :  { %v164_v49 = vsel %vm86_vm2, %v163_v48, 0.0 }
 0x2a3   :  { %165 = vadd.xlane.f32.xlu1 %v164_v49 }
 0x316   :  { %v166_v52 = vpop.xlane.xlu1 %165 }
 0x317   :  { %v167_v53 = vmul.f32 %v166_v52, %v96_v15 }
 0x319   :  { %v168_v54 = vadd.f32 1e-05, %v167_v53 }
 0x31b   :  { %270 = vrsqrt.f32 %v168_v54  ;;  %vm175_vm8 = vweird.f32 %v168_v54 }
 0x321   :  { %v271_v55 = vpop.eup %270 }
 0x322   :  { %v170_v56 = vmul.f32 %v271_v55, %v168_v54  ;;  %vm176_vm7 = vweird.f32 %v271_v55 }
 0x323   :  { %vm177_vm9 = vmor %vm175_vm8, %vm176_vm7 }
 0x324   :  { %v171_v57 = vmul.f32 %v271_v55, %v170_v56 }
 0x326   :  { %v172_v58 = vmul.f32 0.5, %v171_v57 }
 0x328   :  { %v173_v59 = vsub.f32 1.5, %v172_v58 }
 0x32a   :  { %v174_v60 = vmul.f32 %v271_v55, %v173_v59 }
 0x32c   :  { %v178_v62 = vsel %vm177_vm9, %v271_v55, %v174_v60 }
 0x32d   :  { %v179_v63 = vmul.f32 %v178_v62, %v162_v47 }
 0x32f   :  { %v181_v1 = vmul.f32 %v261_v61, %v179_v63 }
 0x331   :  { %v183_v2 = vadd.f32 %v262_v0, %v181_v1 }
 0x333   :  { %272 = vtanh.f32 %v183_v2 }
 0x339   :  { %v273_v3 = vpop.eup %272 }
 0x33a   :  { %v190_v4 = vpack.c.bf16 %v273_v3, %v273_v3 }
 0x33c   :  { %246 = vmatmul.msk.bf16.vlgmr.msra.gmra.mxu2 %vm86_vm2, %v190_v4 }
 0x3bf   :  { %v216_v6 = vpop.f32.mrf.mxu2 }
 0x3c0   :  { %v217_v7 = vadd.f32 %v263_v5, %v216_v6 }
 0x3c2   :  { %221 = vst.msk [vmem:[%s397_s3] sm:$0xff] %vm220_vm10, %v217_v7 }
 0x3c7   :  { %v218_v8 = vpop.f32.mrf.mxu2 }
 0x3c8   :  { %226 = vsyncpa [#allocation3], 1 }
 0x3c9   :  { %227 = vsyncpa [#allocation5], 1 }

</bundles_post_ra>
